<compile_context>
chip_gen: v5e
topology: v5e:2x2
jax: 0.10.0
libtpu: 0.0.40
codegen_flags: <defaults>
</compile_context>

<pallas_src>
import functools

import jax
import jax.numpy as jnp
from jax.experimental import pallas as pl
from jax.experimental.pallas import tpu as pltpu


def _round_up(x: int, m: int) -> int:
    return ((x + m - 1) // m) * m


def _cdiv(a: int, b: int) -> int:
    return -(-a // b)


def _device_kind() -> str:
    try:
        return jax.devices()[0].device_kind.lower()
    except Exception:
        return ""


def _vmem_capacity_bytes() -> int:
    """Physical VMEM per TensorCore; conservative 64 MiB fallback (v7x size)."""
    try:
        return int(pltpu.get_tpu_info().vmem_capacity_bytes)
    except Exception:
        return 64 * 2**20


def fnn_kernel(x_ref, w1_ref, b1_ref, w2_ref, b2_ref, w3_ref, b3_ref, o_ref):
    # One batch tile fully resident in VMEM: 3 MXU matmuls + bias + ReLU, fused.
    # x arrives in f32 (no wrapper pre-pass) and is cast to bf16 on the VPU;
    # accumulation and bias/ReLU math stay in f32; ReLU + bf16 cast stay adjacent
    # so they fuse into one VPU pass (no extra tile*d_h materialization).
    x = x_ref[...].astype(jnp.bfloat16)                                 # (tile, d_in)
    h1 = jnp.dot(x, w1_ref[...], preferred_element_type=jnp.float32) + b1_ref[...]
    h1 = jnp.maximum(h1, 0.0).astype(jnp.bfloat16)
    h2 = jnp.dot(h1, w2_ref[...], preferred_element_type=jnp.float32) + b2_ref[...]
    h2 = jnp.maximum(h2, 0.0).astype(jnp.bfloat16)
    out = jnp.dot(h2, w3_ref[...], preferred_element_type=jnp.float32) + b3_ref[...]
    o_ref[...] = out.astype(o_ref.dtype)                                # lane-dense store


def prepare_params(params):
    """One-time prep: pad feature dims for the MXU and cast weights to bf16.

    Weights: (in_features, out_features) bf16, zero-padded.
    Biases:  (1, padded_dim) f32 so they broadcast over the batch tile in-kernel.

    Input/output dims are padded to multiples of 128 (lane-dense, and aligned
    inputs then need no wrapper-side padding).  The hidden dim is padded to a
    multiple of 256 on v6e/v7x (2x256x256 MXU) when it exceeds 128.
    """
    kind = _device_kind()
    legacy = any(v in kind for v in ("v2", "v3", "v4", "v5"))
    h_align = 128 if legacy else 256

    d_in, d_h = params["w1"].shape
    d_out = params["w3"].shape[1]
    p_in = _round_up(d_in, 128)
    p_h = _round_up(d_h, h_align) if d_h > 128 else 128
    p_out = _round_up(d_out, 128)

    def pad_w(w, rows, cols):
        return jnp.pad(w, ((0, rows - w.shape[0]), (0, cols - w.shape[1]))).astype(jnp.bfloat16)

    def pad_b(b, cols):
        return jnp.pad(b, (0, cols - b.shape[0])).reshape(1, cols).astype(jnp.float32)

    return {
        "w1": pad_w(params["w1"], p_in, p_h), "b1": pad_b(params["b1"], p_h),
        "w2": pad_w(params["w2"], p_h, p_h), "b2": pad_b(params["b2"], p_h),
        "w3": pad_w(params["w3"], p_h, p_out), "b3": pad_b(params["b3"], p_out),
    }


@functools.partial(jax.jit, static_argnames=("output_dim", "tile_n", "out_dtype"))
def fnn_forward(x, prep, *, output_dim, tile_n=None, out_dtype=jnp.float32):
    """x: (n, input_dim) float32. prep: output of prepare_params.

    Returns (n, output_dim) in out_dtype (default f32, matching torch semantics)."""
    n, input_dim = x.shape
    d_in, d_h = prep["w1"].shape
    d_out = prep["w3"].shape[1]
    out_bytes = jnp.dtype(out_dtype).itemsize

    kind = _device_kind()
    is_v7 = "v7" in kind

    # Batch tile: large enough to amortize the ~0.35us grid-step overhead
    # (512-1024 rows when feature dims are modest), never larger than the batch,
    # balanced across steps, and split into >=2 steps on v7x so both TCs work.
    if tile_n is None:
        d_max = max(d_in, d_h, d_out)
        tile_n = 1024 if d_max <= 512 else (512 if d_max <= 2048 else 256)
    n8 = _round_up(n, 8)
    tile_cap = max(8, min(_round_up(tile_n, 8), n8))
    num_steps = _cdiv(n8, tile_cap)
    if is_v7 and num_steps == 1 and n8 >= 16:
        num_steps = 2
    tile = _round_up(_cdiv(n8, num_steps), 8)
    n_pad = num_steps * tile

    # Pad x (still f32 -- the bf16 cast happens in-kernel) only when needed.
    if n_pad != n or d_in != input_dim:
        x = jnp.pad(x, ((0, n_pad - n), (0, d_in - input_dim)))

    grid = (num_steps,)
    single = pl.Buffered(1)  # grid-invariant operands: single-buffer to save VMEM

    # VMEM budget (bytes): single-buffered bf16 weights + f32 biases,
    # double-buffered f32 x tile / out tile, f32 h1/h2 plus their bf16 copies
    # and the bf16 copy of x.
    weights_b = 2 * (d_in * d_h + d_h * d_h + d_h * d_out)
    biases_b = 4 * (2 * d_h + d_out)
    io_b = 2 * (tile * d_in * 4 + tile * d_out * out_bytes)
    interm_b = tile * d_h * (4 + 2) * 2 + tile * d_in * 2
    budget = weights_b + biases_b + io_b + interm_b

    # 20% headroom below physical VMEM: compiler-internal scratch, and on v7x the
    # weights are replicated into both TensorCores' 64 MiB when the grid splits.
    cap = int(_vmem_capacity_bytes() * 0.80)
    if budget > cap:
        # TODO(synk): add a K/N-tiled fallback (stream w2/w3 column tiles,
        # double-buffered behind the MXU) for hidden dims whose fully-resident
        # weights exceed VMEM (~3-4K on v7x, ~6K on v5e/v6e).
        raise NotImplementedError(
            f"hidden_dim={d_h}: fully-resident weights ({budget} B) exceed the "
            f"per-core VMEM budget ({cap} B); K/N-tiled fallback not implemented.")
    vmem_limit = int(min(cap, max(32 * 2**20, 2 * budget)))

    flops = 2 * n_pad * (d_in * d_h + d_h * d_h + d_h * d_out)
    bytes_accessed = n_pad * d_in * 4 + weights_b + biases_b + n_pad * d_out * out_bytes
    cost = pl.CostEstimate(flops=flops, transcendentals=0, bytes_accessed=bytes_accessed)

    out = pl.pallas_call(
        fnn_kernel,
        out_shape=jax.ShapeDtypeStruct((n_pad, d_out), out_dtype),
        grid_spec=pltpu.PrefetchScalarGridSpec(
            num_scalar_prefetch=0,
            grid=grid,
            in_specs=[
                pl.BlockSpec((tile, d_in), lambda i: (i, 0)),                        # x tile (f32)
                pl.BlockSpec((d_in, d_h), lambda i: (0, 0), pipeline_mode=single),   # w1
                pl.BlockSpec((1, d_h), lambda i: (0, 0), pipeline_mode=single),      # b1
                pl.BlockSpec((d_h, d_h), lambda i: (0, 0), pipeline_mode=single),    # w2
                pl.BlockSpec((1, d_h), lambda i: (0, 0), pipeline_mode=single),      # b2
                pl.BlockSpec((d_h, d_out), lambda i: (0, 0), pipeline_mode=single),  # w3
                pl.BlockSpec((1, d_out), lambda i: (0, 0), pipeline_mode=single),    # b3
            ],
            out_specs=pl.BlockSpec((tile, d_out), lambda i: (i, 0)),
        ),
        compiler_params=pltpu.CompilerParams(
            dimension_semantics=("parallel",),  # batch axis shards across v7x's 2 TCs
            vmem_limit_bytes=vmem_limit,
        ),
        cost_estimate=cost,
    )(x, prep["w1"], prep["b1"], prep["w2"], prep["b2"], prep["w3"], prep["b3"])

    # Skip the extra HBM copy when no padding was applied.
    if n_pad != n or d_out != output_dim:
        out = out[:n, :output_dim]
    return out


def init_params(key, input_dim, hidden_dim, output_dim):
    """Mimics torch.nn.Linear default init: U[-1/sqrt(fan_in), 1/sqrt(fan_in)].
    Weights stored as (in_features, out_features)."""
    ks = jax.random.split(key, 6)

    def linear(kw, kb, fan_in, fan_out):
        bound = 1.0 / jnp.sqrt(fan_in)
        w = jax.random.uniform(kw, (fan_in, fan_out), jnp.float32, -bound, bound)
        b = jax.random.uniform(kb, (fan_out,), jnp.float32, -bound, bound)
        return w, b

    w1, b1 = linear(ks[0], ks[1], input_dim, hidden_dim)
    w2, b2 = linear(ks[2], ks[3], hidden_dim, hidden_dim)
    w3, b3 = linear(ks[4], ks[5], hidden_dim, output_dim)
    return {"w1": w1, "b1": b1, "w2": w2, "b2": b2, "w3": w3, "b3": b3}


def fnn_reference(x, p):
    """Pure-JAX reference emulating the kernel math: bf16 operands, f32 accumulation."""
    bf = lambda a: a.astype(jnp.bfloat16).astype(jnp.float32)
    hp = jax.lax.Precision.HIGHEST
    h = jnp.maximum(jnp.dot(bf(x), bf(p["w1"]), precision=hp) + p["b1"], 0.0)
    h = jnp.maximum(jnp.dot(bf(h), bf(p["w2"]), precision=hp) + p["b2"], 0.0)
    return jnp.dot(bf(h), bf(p["w3"]), precision=hp) + p["b3"]


if __name__ == "__main__":
    key = jax.random.PRNGKey(0)
    k_x, k_p, k_x2, k_p2 = jax.random.split(key, 4)

    # Small shapes matching the module's intent (DQN value network).
    n, input_dim, hidden_dim, output_dim = 8, 16, 32, 4
    x = jax.random.normal(k_x, (n, input_dim), jnp.float32)
    params = init_params(k_p, input_dim, hidden_dim, output_dim)
    prep = prepare_params(params)

    out = jax.block_until_ready(fnn_forward(x, prep, output_dim=output_dim))
    ref = fnn_reference(x, params)
    assert out.shape == (n, output_dim), out.shape
    assert jnp.allclose(out, ref, atol=1e-2, rtol=1e-2), "mismatch vs reference (small)"

    # Second check with 128-scale / non-aligned dims to exercise the real layout
    # path: batch padding, balanced multi-step grid, lane-dense stores, no
    # wrapper cast pre-pass (input_dim already 128-aligned).
    n2, in2, hid2, out2 = 200, 128, 256, 10
    x2 = jax.random.normal(k_x2, (n2, in2), jnp.float32)
    params2 = init_params(k_p2, in2, hid2, out2)
    prep2 = prepare_params(params2)
    o2 = jax.block_until_ready(fnn_forward(x2, prep2, output_dim=out2, tile_n=64))
    r2 = fnn_reference(x2, params2)
    assert o2.shape == (n2, out2), o2.shape
    assert jnp.allclose(o2, r2, atol=2e-2, rtol=2e-2), "mismatch vs reference (large)"

    print("KERNEL_OK")
</pallas_src>

<mosaic_0001>
module attributes {stable_mosaic.version = 11 : i64} {
  func.func @fnn_kernel(%arg0: i32, %arg1: memref<8x128xf32, #tpu.memory_space<vmem>>, %arg2: memref<128x128xbf16, #tpu.memory_space<vmem>>, %arg3: memref<1x128xf32, #tpu.memory_space<vmem>>, %arg4: memref<128x128xbf16, #tpu.memory_space<vmem>>, %arg5: memref<1x128xf32, #tpu.memory_space<vmem>>, %arg6: memref<128x128xbf16, #tpu.memory_space<vmem>>, %arg7: memref<1x128xf32, #tpu.memory_space<vmem>>, %arg8: memref<8x128xf32, #tpu.memory_space<vmem>>) attributes {dimension_semantics = [#tpu.dimension_semantics<parallel>], iteration_bounds = array<i64: 1>, scalar_prefetch = 0 : i64, scratch_operands = 0 : i64, tpu.core_type = #tpu.core_type<tc>, window_params = [{transform_indices = @transform_0, window_bounds = array<i64: 8, 128>}, {pipeline_mode = #tpu.pipeline_mode<synchronous>, transform_indices = @transform_1, window_bounds = array<i64: 128, 128>}, {pipeline_mode = #tpu.pipeline_mode<synchronous>, transform_indices = @transform_2, window_bounds = array<i64: 1, 128>}, {pipeline_mode = #tpu.pipeline_mode<synchronous>, transform_indices = @transform_3, window_bounds = array<i64: 128, 128>}, {pipeline_mode = #tpu.pipeline_mode<synchronous>, transform_indices = @transform_4, window_bounds = array<i64: 1, 128>}, {pipeline_mode = #tpu.pipeline_mode<synchronous>, transform_indices = @transform_5, window_bounds = array<i64: 128, 128>}, {pipeline_mode = #tpu.pipeline_mode<synchronous>, transform_indices = @transform_6, window_bounds = array<i64: 1, 128>}, {transform_indices = @transform_7, window_bounds = array<i64: 8, 128>}]} {
    %c0 = arith.constant 0 : index
    %c0_0 = arith.constant 0 : index
    %0 = vector.load %arg1[%c0, %c0_0] : memref<8x128xf32, #tpu.memory_space<vmem>>, vector<8x128xf32>
    %1 = arith.truncf %0 : vector<8x128xf32> to vector<8x128xbf16>
    %c0_1 = arith.constant 0 : index
    %c0_2 = arith.constant 0 : index
    %2 = vector.load %arg2[%c0_1, %c0_2] : memref<128x128xbf16, #tpu.memory_space<vmem>>, vector<128x128xbf16>
    %cst = arith.constant dense<0.000000e+00> : vector<8x128xf32>
    %3 = tpu.matmul %1, %2, %cst {dimension_numbers = #tpu.dot_dimension_numbers<[1], [0], [0], [1], [0, 0, 1, 1], [], []>} : vector<8x128xbf16>, vector<128x128xbf16>, vector<8x128xf32> -> vector<8x128xf32>
    %c0_3 = arith.constant 0 : index
    %c0_4 = arith.constant 0 : index
    %4 = vector.load %arg3[%c0_3, %c0_4] : memref<1x128xf32, #tpu.memory_space<vmem>>, vector<1x128xf32>
    %5 = vector.broadcast %4 : vector<1x128xf32> to vector<8x128xf32>
    %6 = arith.addf %3, %5 : vector<8x128xf32>
    %cst_5 = arith.constant 0.000000e+00 : f32
    %7 = vector.broadcast %cst_5 : f32 to vector<8x128xf32>
    %8 = arith.maximumf %6, %7 : vector<8x128xf32>
    %9 = arith.truncf %8 : vector<8x128xf32> to vector<8x128xbf16>
    %c0_6 = arith.constant 0 : index
    %c0_7 = arith.constant 0 : index
    %10 = vector.load %arg4[%c0_6, %c0_7] : memref<128x128xbf16, #tpu.memory_space<vmem>>, vector<128x128xbf16>
    %cst_8 = arith.constant dense<0.000000e+00> : vector<8x128xf32>
    %11 = tpu.matmul %9, %10, %cst_8 {dimension_numbers = #tpu.dot_dimension_numbers<[1], [0], [0], [1], [0, 0, 1, 1], [], []>} : vector<8x128xbf16>, vector<128x128xbf16>, vector<8x128xf32> -> vector<8x128xf32>
    %c0_9 = arith.constant 0 : index
    %c0_10 = arith.constant 0 : index
    %12 = vector.load %arg5[%c0_9, %c0_10] : memref<1x128xf32, #tpu.memory_space<vmem>>, vector<1x128xf32>
    %13 = vector.broadcast %12 : vector<1x128xf32> to vector<8x128xf32>
    %14 = arith.addf %11, %13 : vector<8x128xf32>
    %cst_11 = arith.constant 0.000000e+00 : f32
    %15 = vector.broadcast %cst_11 : f32 to vector<8x128xf32>
    %16 = arith.maximumf %14, %15 : vector<8x128xf32>
    %17 = arith.truncf %16 : vector<8x128xf32> to vector<8x128xbf16>
    %c0_12 = arith.constant 0 : index
    %c0_13 = arith.constant 0 : index
    %18 = vector.load %arg6[%c0_12, %c0_13] : memref<128x128xbf16, #tpu.memory_space<vmem>>, vector<128x128xbf16>
    %cst_14 = arith.constant dense<0.000000e+00> : vector<8x128xf32>
    %19 = tpu.matmul %17, %18, %cst_14 {dimension_numbers = #tpu.dot_dimension_numbers<[1], [0], [0], [1], [0, 0, 1, 1], [], []>} : vector<8x128xbf16>, vector<128x128xbf16>, vector<8x128xf32> -> vector<8x128xf32>
    %c0_15 = arith.constant 0 : index
    %c0_16 = arith.constant 0 : index
    %20 = vector.load %arg7[%c0_15, %c0_16] : memref<1x128xf32, #tpu.memory_space<vmem>>, vector<1x128xf32>
    %21 = vector.broadcast %20 : vector<1x128xf32> to vector<8x128xf32>
    %22 = arith.addf %19, %21 : vector<8x128xf32>
    %c0_17 = arith.constant 0 : index
    %c0_18 = arith.constant 0 : index
    %23 = vector.load %arg8[%c0_17, %c0_18] : memref<8x128xf32, #tpu.memory_space<vmem>>, vector<8x128xf32>
    tpu.vector_store %arg8[%c0_17, %c0_18], %22 {strides = array<i32>} : memref<8x128xf32, #tpu.memory_space<vmem>>, vector<8x128xf32>,
    return
  }
  func.func @transform_0(%arg0: i32) -> (i32, i32) {
    %c0_i32 = arith.constant 0 : i32
    %c0_i32_0 = arith.constant 0 : i32
    return %arg0, %c0_i32 : i32, i32
  }
  func.func @transform_1(%arg0: i32) -> (i32, i32) {
    %c0_i32 = arith.constant 0 : i32
    %c0_i32_0 = arith.constant 0 : i32
    %c0_i32_1 = arith.constant 0 : i32
    return %c0_i32, %c0_i32_0 : i32, i32
  }
  func.func @transform_2(%arg0: i32) -> (i32, i32) {
    %c0_i32 = arith.constant 0 : i32
    %c0_i32_0 = arith.constant 0 : i32
    %c0_i32_1 = arith.constant 0 : i32
    return %c0_i32, %c0_i32_0 : i32, i32
  }
  func.func @transform_3(%arg0: i32) -> (i32, i32) {
    %c0_i32 = arith.constant 0 : i32
    %c0_i32_0 = arith.constant 0 : i32
    %c0_i32_1 = arith.constant 0 : i32
    return %c0_i32, %c0_i32_0 : i32, i32
  }
  func.func @transform_4(%arg0: i32) -> (i32, i32) {
    %c0_i32 = arith.constant 0 : i32
    %c0_i32_0 = arith.constant 0 : i32
    %c0_i32_1 = arith.constant 0 : i32
    return %c0_i32, %c0_i32_0 : i32, i32
  }
  func.func @transform_5(%arg0: i32) -> (i32, i32) {
    %c0_i32 = arith.constant 0 : i32
    %c0_i32_0 = arith.constant 0 : i32
    %c0_i32_1 = arith.constant 0 : i32
    return %c0_i32, %c0_i32_0 : i32, i32
  }
  func.func @transform_6(%arg0: i32) -> (i32, i32) {
    %c0_i32 = arith.constant 0 : i32
    %c0_i32_0 = arith.constant 0 : i32
    %c0_i32_1 = arith.constant 0 : i32
    return %c0_i32, %c0_i32_0 : i32, i32
  }
  func.func @transform_7(%arg0: i32) -> (i32, i32) {
    %c0_i32 = arith.constant 0 : i32
    %c0_i32_0 = arith.constant 0 : i32
    return %arg0, %c0_i32 : i32, i32
  }
}

</mosaic_0001>

<bundles_post_ra>
// kernel: fnn_forward.1
= control target key start
LH: loop header
LB: loop body
LE: loop exit
PB: predicated region body
PF: predicated region fallthrough
CT: control target
= control target key end

     0   :  { %12 = vsyncpa [#allocation3], 0  ;;  %s602_s0 = inlined_call_operand.vmem [shape: f32[8,128], index: 0, kind: input, shape index: {}]   ;;  %s603_s1 = inlined_call_operand.hbm [shape: bf16[128,128], index: 1, kind: input, shape index: {}]   ;;  %s604_s2 = inlined_call_operand.vmem [shape: f32[1,128], index: 2, kind: input, shape index: {}]   ;;  %s605_s3 = inlined_call_operand.hbm [shape: bf16[128,128], index: 3, kind: input, shape index: {}]   ;;  %s606_s4 = inlined_call_operand.vmem [shape: f32[1,128], index: 4, kind: input, shape index: {}]   ;;  %s607_s5 = inlined_call_operand.hbm [shape: bf16[128,128], index: 5, kind: input, shape index: {}]   ;;  %s608_s6 = inlined_call_operand.vmem [shape: f32[1,128], index: 6, kind: input, shape index: {}]   ;;  %s609_s7 = inlined_call_operand.vmem [shape: f32[8,128], index: 7, kind: output, shape index: {}]  }
   0x1   :  { %13 = vsyncpa [#allocation5], 0  ;;  %s35_s26 = sshll.u32 %s605_s3, 4  ;;  %s533_s27 = smov [#allocation4]   ;;  %s36_s26 = int_to_ptr.hbm [resolvable:$true] %s35_s26 }
   0x2   :  { %s37_s28 = sshll.u32 %s533_s27, 4  ;;  %s20_s8 = sshll.u32 %s603_s1, 4  ;;  %s38_s28 = int_to_ptr.vmem [resolvable:$true] %s37_s28  ;;  %s21_s8 = int_to_ptr.hbm [resolvable:$true] %s20_s8 }
   0x3   :  { %s534_s9 = smov 64   ;;  %s535_s10 = smov 4  }
   0x4   :  { %43 = dma.hbm_to_vmem [thread:$0]  %s36_s26, 1024, %s38_s28, [#allocation5], %s534_s9, %s534_s9, %s535_s10  }
   0x5   :  { %s536_s11 = smov [#allocation2]   ;;  %s50_s15 = sshll.u32 %s607_s5, 4  ;;  %s51_s15 = int_to_ptr.hbm [resolvable:$true] %s50_s15 }
   0x6   :  { %s22_s12 = sshll.u32 %s536_s11, 4  ;;  %s537_s3 = smov [#allocation6]   ;;  %s23_s12 = int_to_ptr.vmem [resolvable:$true] %s22_s12 }
   0x7   :  { %28 = dma.hbm_to_vmem [thread:$0]  %s21_s8, 1024, %s23_s12, [#allocation3], %s534_s9, %s534_s9, %s535_s10  }
   0x8   :  { %s52_s16 = sshll.u32 %s537_s3, 4  ;;  %s53_s16 = int_to_ptr.vmem [resolvable:$true] %s52_s16 }
   0x9   :  { %58 = dma.hbm_to_vmem [thread:$0]  %s51_s15, 1024, %s53_s16, [#allocation5], %s534_s9, %s534_s9, %s535_s10  }
   0xa   :  { %529 = dma.done.wait [#allocation3], 1024  }
   0xb   :  { %530 = vsyncadd [#allocation3], 4294966272 }
   0xc   :  { %531 = dma.done.wait [#allocation5], 2048  }
   0xd   :  { %532 = vsyncadd [#allocation5], 4294965248  ;;  %v432_v0 = vld [vmem:[#allocation2 + $0x38] sm:$0xff]  ;;  %v431_v1 = vld [vmem:[#allocation2 + $0x30] sm:$0xff] }
   0xe   :  { %143 = vmatpush.bf16.msra.mxu0 %v432_v0  ;;  %v440_v2 = vld [vmem:[#allocation4 + $0x38] sm:$0xff]  ;;  %v439_v3 = vld [vmem:[#allocation4 + $0x30] sm:$0xff]  ;;  %v430_v4 = vld [vmem:[#allocation2 + $0x28] sm:$0xff] }
   0xf   :  { %226 = vmatpush.bf16.msra.mxu1 %v440_v2  ;;  %v438_v5 = vld [vmem:[#allocation4 + $0x28] sm:$0xff]  ;;  %v429_v6 = vld [vmem:[#allocation2 + $0x20] sm:$0xff]  ;;  %v428_v8 = vld [vmem:[#allocation2 + $0x18] sm:$0xff] }
  0x10   :  { %v437_v7 = vld [vmem:[#allocation4 + $0x20] sm:$0xff]  ;;  %v436_v9 = vld [vmem:[#allocation4 + $0x18] sm:$0xff]  ;;  %v427_v10 = vld [vmem:[#allocation2 + $0x10] sm:$0xff] }
  0x11   :  { %v435_v11 = vld [vmem:[#allocation4 + $0x10] sm:$0xff]  ;;  %v426_v12 = vld [vmem:[#allocation2 + $0x8] sm:$0xff]  ;;  %v425_v13 = vld [vmem:[#allocation2] sm:$0xff] }
  0x12   :  { %144 = vmatpush.bf16.msra.mxu0 %v431_v1  ;;  %v73_v14 = vld [vmem:[%s602_s0] sm:$0xff]  ;;  %v434_v16 = vld [vmem:[#allocation4 + $0x8] sm:$0xff]  ;;  %v448_v18 = vld [vmem:[#allocation6 + $0x38] sm:$0xff] }
  0x13   :  { %227 = vmatpush.bf16.msra.mxu1 %v439_v3  ;;  %v74_v15 = vpack.c.bf16 %v73_v14, %v73_v14  ;;  %v433_v17 = vld [vmem:[#allocation4] sm:$0xff]  ;;  %309 = vmatpush.bf16.msra.mxu2 %v448_v18  ;;  %v447_v19 = vld [vmem:[#allocation6 + $0x30] sm:$0xff]  ;;  %v446_v20 = vld [vmem:[#allocation6 + $0x28] sm:$0xff] }
  0x14   :  { %v445_v21 = vld [vmem:[#allocation6 + $0x20] sm:$0xff]  ;;  %v444_v22 = vld [vmem:[#allocation6 + $0x18] sm:$0xff]  ;;  %v443_v23 = vld [vmem:[#allocation6 + $0x10] sm:$0xff] }
  0x15   :  { %v454_v24 = vld [vmem:[%s604_s2] ss:$0 sm:$0xff]  ;;  %v442_v30 = vld [vmem:[#allocation6 + $0x8] sm:$0xff] }
  0x16   :  { %145 = vmatpush.bf16.msra.mxu0 %v430_v4  ;;  %v441_v31 = vld [vmem:[#allocation6] sm:$0xff] }
  0x17   :  { %228 = vmatpush.bf16.msra.mxu1 %v438_v5  ;;  %310 = vmatpush.bf16.msra.mxu2 %v447_v19  ;;  %v455_v32 = vld [vmem:[%s606_s4] ss:$0 sm:$0xff] }
  0x18   :  { %v456_v38 = vld [vmem:[%s608_s6] ss:$0 sm:$0xff] }
  0x1a   :  { %146 = vmatpush.bf16.msra.mxu0 %v429_v6 }
  0x1b   :  { %229 = vmatpush.bf16.msra.mxu1 %v437_v7  ;;  %311 = vmatpush.bf16.msra.mxu2 %v446_v20 }
  0x1e   :  { %147 = vmatpush.bf16.msra.mxu0 %v428_v8 }
  0x1f   :  { %230 = vmatpush.bf16.msra.mxu1 %v436_v9  ;;  %312 = vmatpush.bf16.msra.mxu2 %v445_v21 }
  0x22   :  { %148 = vmatpush.bf16.msra.mxu0 %v427_v10 }
  0x23   :  { %231 = vmatpush.bf16.msra.mxu1 %v435_v11  ;;  %313 = vmatpush.bf16.msra.mxu2 %v444_v22 }
  0x26   :  { %149 = vmatpush.bf16.msra.mxu0 %v426_v12 }
  0x27   :  { %232 = vmatpush.bf16.msra.mxu1 %v434_v16  ;;  %314 = vmatpush.bf16.msra.mxu2 %v443_v23 }
  0x2a   :  { %150 = vmatpush.bf16.msra.mxu0 %v425_v13 }
  0x2b   :  { %233 = vmatpush.bf16.msra.mxu1 %v433_v17  ;;  %315 = vmatpush.bf16.msra.mxu2 %v442_v30 }
  0x2d   :  { %151 = vmatmul.bf16.vlgmr.msra.gmra.mxu0 %v74_v15 }
  0x2f   :  { %316 = vmatpush.bf16.msra.mxu2 %v441_v31 }
  0xaa   :  { %v152_v25 = vpop.f32.mrf.mxu0 }
  0xab   :  { %v153_v26 = vadd.f32 %v454_v24, %v152_v25 }
  0xad   :  { %v156_v27 = vmax.f32 %v153_v26, 0.0 }
  0xaf   :  { %v157_v28 = vpack.c.bf16 %v156_v27, %v156_v27 }
  0xb1   :  { %234 = vmatmul.bf16.vlgmr.msra.gmra.mxu1 %v157_v28 }
  0xb2   :  { %v154_v29 = vpop.f32.mrf.mxu0 }
 0x12e   :  { %v235_v33 = vpop.f32.mrf.mxu1 }
 0x12f   :  { %v236_v34 = vadd.f32 %v455_v32, %v235_v33 }
 0x131   :  { %v239_v35 = vmax.f32 %v236_v34, 0.0 }
 0x133   :  { %v240_v36 = vpack.c.bf16 %v239_v35, %v239_v35 }
 0x135   :  { %317 = vmatmul.bf16.vlgmr.msra.gmra.mxu2 %v240_v36 }
 0x136   :  { %v237_v37 = vpop.f32.mrf.mxu1 }
 0x1b8   :  { %v318_v39 = vpop.f32.mrf.mxu2 }
 0x1b9   :  { %v319_v40 = vadd.f32 %v456_v38, %v318_v39 }
 0x1bb   :  { %322 = vst [vmem:[%s609_s7] sm:$0xff] %v319_v40 }
 0x1c0   :  { %v320_v41 = vpop.f32.mrf.mxu2 }
 0x1c1   :  { %327 = vsyncpa [#allocation3], 1 }
 0x1c2   :  { %328 = vsyncpa [#allocation5], 1 }

</bundles_post_ra>
